<compile_context>
chip_gen: v6e
topology: v6e:2x2x1
jax: 0.10.0
libtpu: 0.0.40
codegen_flags: <defaults>
</compile_context>

<pallas_src>
import functools

import jax
import jax.numpy as jnp
from jax.experimental import pallas as pl
from jax.experimental.pallas import tpu as pltpu


# ------------------------- fused eval-tail kernel ----------------------------
def _moco_tail_kernel(
    x_ref,        # (TM, D)        tiled text-local features
    w_sw_ref,     # (D, 2P)        packed [mat.T | mat1.T]
    vg_ref,       # (B, V_OUT)     visual global feature
    tg_ref,       # (B, T_OUT)     textual global feature
    ins_ref,      # (B, P)         diora inside_h[:, 0]
    outs_ref,     # (B, P)         diora outside_h[:, 0]
    wg_v_ref,     # (V_OUT, 2E)    v global-column block, zero-padded into slab
    wg_t_ref,     # (T_OUT, 2E)    t global-column block, zero-padded into slab
    w_ins_ref,    # (P, 2E)        packed [v inside cols | t inside cols]
    w_out_ref,    # (P, 2E)        packed [v outside cols | t outside cols]
    b_ref,        # (1, 2E)        packed [v bias | t bias]
    sw_ref,       # (TM, 2P) out   packed [emb_span | emb_word]
    vt_ref,       # (B, 2E)  out   packed [v_embed | t_embed]
):
    # Embed: one wide MXU matmul per row tile (span & word fused along lanes).
    sw_ref[...] = jnp.dot(
        x_ref[...], w_sw_ref[...], preferred_element_type=jnp.float32
    )

    # The two Linear layers are tiny (B rows) -> compute once; their blocks are
    # resident across the row-tile axis (hence "arbitrary" semantics).
    @pl.when(pl.program_id(0) == 0)
    def _():
        vt_ref[...] = (
            jnp.dot(ins_ref[...], w_ins_ref[...], preferred_element_type=jnp.float32)
            + jnp.dot(outs_ref[...], w_out_ref[...], preferred_element_type=jnp.float32)
            + jnp.dot(vg_ref[...], wg_v_ref[...], preferred_element_type=jnp.float32)
            + jnp.dot(tg_ref[...], wg_t_ref[...], preferred_element_type=jnp.float32)
            + b_ref[...]
        )


# --------------------------- parameter packing --------------------------------
def prepare_params(params):
    """One-time repack: no per-forward transposes / concatenates of weights.

    Returns a dict of ARRAYS only (no python ints) so it can be passed through
    jit as a regular pytree; all static shape info is recovered from the
    arrays' shapes inside the wrapper.
    """
    P = params["t_proj_mat"].shape[0]
    E = params["v_embed_w"].shape[0]
    V_OUT = params["v_embed_w"].shape[1] - 2 * P
    T_OUT = params["t_embed_w"].shape[1] - 2 * P

    wv = params["v_embed_w"]   # (E, V_OUT + 2P)
    wt = params["t_embed_w"]   # (E, T_OUT + 2P)

    # Global-feature column blocks, zero-padded into the packed (., 2E) slab so
    # the kernel needs no lane-axis concatenate:
    #   columns [0, E)  -> v_embed, columns [E, 2E) -> t_embed.
    wg_v = jnp.concatenate(
        [wv[:, :V_OUT].T, jnp.zeros((V_OUT, E), jnp.float32)], axis=1
    )                                                               # (V_OUT, 2E)
    wg_t = jnp.concatenate(
        [jnp.zeros((T_OUT, E), jnp.float32), wt[:, :T_OUT].T], axis=1
    )                                                               # (T_OUT, 2E)

    packed = {
        # Embed weights packed along the output axis: (D, 2P)
        "w_span_word": jnp.concatenate(
            [params["t_proj_mat"].T, params["t_proj_mat1"].T], axis=1
        ),
        "wg_v": wg_v,                                               # (V_OUT, 2E)
        "wg_t": wg_t,                                               # (T_OUT, 2E)
        "w_ins": jnp.concatenate(
            [wv[:, V_OUT:V_OUT + P].T, wt[:, T_OUT:T_OUT + P].T], axis=1
        ),                                                          # (P, 2E)
        "w_out": jnp.concatenate(
            [wv[:, V_OUT + P:].T, wt[:, T_OUT + P:].T], axis=1
        ),                                                          # (P, 2E)
        "b": jnp.concatenate(
            [params["v_embed_b"], params["t_embed_b"]]
        ).reshape(1, 2 * E),                                        # (1, 2E)
    }
    return packed


# --------------------------- MoCoHead eval forward ----------------------------
@functools.partial(jax.jit, static_argnames=("tile_rows",))
def moco_head_eval_forward(
    packed,             # output of prepare_params (arrays only)
    v_feat_global,      # high_level_v_feature_global   (B, V_OUT)
    t_feat_global,      # high_level_t_feature_global   (B, T_OUT)
    t_feat_local,       # high_level_t_feature_local    (B, L, T_OUT)
    inside_h_global,    # diora.chart.inside_h[:, 0]    (B, P)
    outside_h_global,   # diora.chart.outside_h[:, 0]   (B, P)
    tile_rows=512,
):
    # TODO(synk): DioraMLP / ImageEncoder / visual+textual encoders are external
    # modules not provided; their outputs (inside/outside chart globals and the
    # global features) are supplied as inputs instead of being computed here.
    B, L, D = t_feat_local.shape
    # Static shape info recovered from the packed arrays (no traced shape use).
    P = packed["w_span_word"].shape[1] // 2
    E = packed["b"].shape[1] // 2
    V_OUT = v_feat_global.shape[1]
    T_OUT = t_feat_global.shape[1]

    rows = B * L
    x2d = t_feat_local.reshape(rows, D)

    # Row tile: full array when small (block == full dim is always legal),
    # otherwise a large pipelined tile (multiple of 8; padded if ragged).
    if rows <= tile_rows:
        TM = rows
        rows_p = rows
    else:
        TM = tile_rows
        rows_p = pl.cdiv(rows, TM) * TM
        if rows_p != rows:
            x2d = jnp.pad(x2d, ((0, rows_p - rows), (0, 0)))
    grid = (rows_p // TM,)

    sw, vt = pl.pallas_call(
        _moco_tail_kernel,
        out_shape=(
            jax.ShapeDtypeStruct((rows_p, 2 * P), jnp.float32),
            jax.ShapeDtypeStruct((B, 2 * E), jnp.float32),
        ),
        grid_spec=pltpu.PrefetchScalarGridSpec(
            num_scalar_prefetch=0,
            grid=grid,
            in_specs=[
                pl.BlockSpec((TM, D), lambda i: (i, 0)),          # x (tiled)
                pl.BlockSpec((D, 2 * P), lambda i: (0, 0)),       # packed embed W
                pl.BlockSpec((B, V_OUT), lambda i: (0, 0)),       # v global
                pl.BlockSpec((B, T_OUT), lambda i: (0, 0)),       # t global
                pl.BlockSpec((B, P), lambda i: (0, 0)),           # inside
                pl.BlockSpec((B, P), lambda i: (0, 0)),           # outside
                pl.BlockSpec((V_OUT, 2 * E), lambda i: (0, 0)),   # Wg_v (padded)
                pl.BlockSpec((T_OUT, 2 * E), lambda i: (0, 0)),   # Wg_t (padded)
                pl.BlockSpec((P, 2 * E), lambda i: (0, 0)),       # W_ins packed
                pl.BlockSpec((P, 2 * E), lambda i: (0, 0)),       # W_out packed
                pl.BlockSpec((1, 2 * E), lambda i: (0, 0)),       # bias packed
            ],
            out_specs=(
                pl.BlockSpec((TM, 2 * P), lambda i: (i, 0)),      # [span|word]
                pl.BlockSpec((B, 2 * E), lambda i: (0, 0)),       # [v_emb|t_emb]
            ),
        ),
        compiler_params=pltpu.CompilerParams(
            # vt output block is resident across the row-tile axis -> arbitrary.
            dimension_semantics=("arbitrary",),
        ),
    )(
        x2d,
        packed["w_span_word"],
        v_feat_global,
        t_feat_global,
        inside_h_global,
        outside_h_global,
        packed["wg_v"],
        packed["wg_t"],
        packed["w_ins"],
        packed["w_out"],
        packed["b"],
    )

    sw = sw[:rows]
    emb_span = sw[:, :P].reshape(B, L, P)
    emb_word = sw[:, P:].reshape(B, L, P)
    v_embed = vt[:, :E]
    t_embed = vt[:, E:]
    return [v_embed, t_embed], (emb_span, emb_word)


# ------------------------------- reference ------------------------------------
def _reference(params, v_g, t_g, t_l, ins, outs):
    B, L, D = t_l.shape
    x2d = t_l.reshape(-1, D)
    span = (x2d @ params["t_proj_mat"].T).reshape(B, L, -1)
    word = (x2d @ params["t_proj_mat1"].T).reshape(B, L, -1)
    v_cat = jnp.concatenate([v_g, ins, outs], axis=1)
    t_cat = jnp.concatenate([t_g, ins, outs], axis=1)
    v_e = v_cat @ params["v_embed_w"].T + params["v_embed_b"]
    t_e = t_cat @ params["t_embed_w"].T + params["t_embed_b"]
    return [v_e, t_e], (span, word)


if __name__ == "__main__":
    # Small, forward-consistent shapes.
    B = 2            # batch
    L = 8            # text sequence length (local textual features)
    V_OUT = 32       # visual_model.out_channels
    T_OUT = 32       # textual_model.out_channels
    PROJ = 16        # cfg.CLIORA.PROJ_DIM
    EMBED = 32       # cfg.MODEL.EMBEDDING.FEATURE_SIZE

    key = jax.random.PRNGKey(0)
    keys = jax.random.split(key, 10)

    # Deterministic parameter init (synthetic, matching __init__ shapes).
    params = {
        # Embed: mat, mat1 ~ N(0, 1), shape (size, input_size)
        "t_proj_mat": jax.random.normal(keys[0], (PROJ, T_OUT), jnp.float32),
        "t_proj_mat1": jax.random.normal(keys[1], (PROJ, T_OUT), jnp.float32),
        # v_embed_layer: Linear(V_OUT + 2*PROJ, EMBED), kaiming fan_out, bias 0
        "v_embed_w": jax.random.normal(keys[2], (EMBED, V_OUT + 2 * PROJ), jnp.float32)
        * jnp.sqrt(2.0 / EMBED),
        "v_embed_b": jnp.zeros((EMBED,), jnp.float32),
        # t_embed_layer: Linear(T_OUT + 2*PROJ, EMBED)
        "t_embed_w": jax.random.normal(keys[3], (EMBED, T_OUT + 2 * PROJ), jnp.float32)
        * jnp.sqrt(2.0 / EMBED),
        "t_embed_b": jnp.zeros((EMBED,), jnp.float32),
    }

    # Synthetic stand-ins for encoder / diora outputs.
    v_feat_global = jax.random.normal(keys[4], (B, V_OUT), jnp.float32)
    t_feat_global = jax.random.normal(keys[5], (B, T_OUT), jnp.float32)
    t_feat_local = jax.random.normal(keys[6], (B, L, T_OUT), jnp.float32)
    inside_h_global = jax.random.normal(keys[7], (B, PROJ), jnp.float32)
    outside_h_global = jax.random.normal(keys[8], (B, PROJ), jnp.float32)

    # One-time weight repack (no per-forward transposes / concats of weights).
    packed = prepare_params(params)

    (v_embed, t_embed), (emb_span, emb_word) = moco_head_eval_forward(
        packed, v_feat_global, t_feat_global, t_feat_local,
        inside_h_global, outside_h_global,
    )
    jax.block_until_ready(v_embed)
    jax.block_until_ready(t_embed)
    jax.block_until_ready(emb_span)
    jax.block_until_ready(emb_word)

    # Verify against plain-JAX reference.
    (v_ref, t_ref), (span_ref, word_ref) = _reference(
        params, v_feat_global, t_feat_global, t_feat_local,
        inside_h_global, outside_h_global,
    )
    assert jnp.allclose(v_embed, v_ref, atol=1e-4, rtol=1e-4)
    assert jnp.allclose(t_embed, t_ref, atol=1e-4, rtol=1e-4)
    assert jnp.allclose(emb_span, span_ref, atol=1e-4, rtol=1e-4)
    assert jnp.allclose(emb_word, word_ref, atol=1e-4, rtol=1e-4)

    print("KERNEL_OK")
</pallas_src>

<mosaic_0001>
module attributes {stable_mosaic.version = 11 : i64} {
  func.func @_moco_tail_kernel(%arg0: i32, %arg1: memref<16x32xf32, #tpu.memory_space<vmem>>, %arg2: memref<32x32xf32, #tpu.memory_space<vmem>>, %arg3: memref<2x32xf32, #tpu.memory_space<vmem>>, %arg4: memref<2x32xf32, #tpu.memory_space<vmem>>, %arg5: memref<2x16xf32, #tpu.memory_space<vmem>>, %arg6: memref<2x16xf32, #tpu.memory_space<vmem>>, %arg7: memref<32x64xf32, #tpu.memory_space<vmem>>, %arg8: memref<32x64xf32, #tpu.memory_space<vmem>>, %arg9: memref<16x64xf32, #tpu.memory_space<vmem>>, %arg10: memref<16x64xf32, #tpu.memory_space<vmem>>, %arg11: memref<1x64xf32, #tpu.memory_space<vmem>>, %arg12: memref<16x32xf32, #tpu.memory_space<vmem>>, %arg13: memref<2x64xf32, #tpu.memory_space<vmem>>) attributes {dimension_semantics = [#tpu.dimension_semantics<arbitrary>], iteration_bounds = array<i64: 1>, scalar_prefetch = 0 : i64, scratch_operands = 0 : i64, tpu.core_type = #tpu.core_type<tc>, window_params = [{transform_indices = @transform_0, window_bounds = array<i64: 16, 32>}, {pipeline_mode = #tpu.pipeline_mode<synchronous>, transform_indices = @transform_1, window_bounds = array<i64: 32, 32>}, {pipeline_mode = #tpu.pipeline_mode<synchronous>, transform_indices = @transform_2, window_bounds = array<i64: 2, 32>}, {pipeline_mode = #tpu.pipeline_mode<synchronous>, transform_indices = @transform_3, window_bounds = array<i64: 2, 32>}, {pipeline_mode = #tpu.pipeline_mode<synchronous>, transform_indices = @transform_4, window_bounds = array<i64: 2, 16>}, {pipeline_mode = #tpu.pipeline_mode<synchronous>, transform_indices = @transform_5, window_bounds = array<i64: 2, 16>}, {pipeline_mode = #tpu.pipeline_mode<synchronous>, transform_indices = @transform_6, window_bounds = array<i64: 32, 64>}, {pipeline_mode = #tpu.pipeline_mode<synchronous>, transform_indices = @transform_7, window_bounds = array<i64: 32, 64>}, {pipeline_mode = #tpu.pipeline_mode<synchronous>, transform_indices = @transform_8, window_bounds = array<i64: 16, 64>}, {pipeline_mode = #tpu.pipeline_mode<synchronous>, transform_indices = @transform_9, window_bounds = array<i64: 16, 64>}, {pipeline_mode = #tpu.pipeline_mode<synchronous>, transform_indices = @transform_10, window_bounds = array<i64: 1, 64>}, {transform_indices = @transform_11, window_bounds = array<i64: 16, 32>}, {pipeline_mode = #tpu.pipeline_mode<synchronous>, transform_indices = @transform_12, window_bounds = array<i64: 2, 64>}]} {
    %c0 = arith.constant 0 : index
    %c0_0 = arith.constant 0 : index
    %0 = vector.load %arg1[%c0, %c0_0] : memref<16x32xf32, #tpu.memory_space<vmem>>, vector<16x32xf32>
    %c0_1 = arith.constant 0 : index
    %c0_2 = arith.constant 0 : index
    %1 = vector.load %arg2[%c0_1, %c0_2] : memref<32x32xf32, #tpu.memory_space<vmem>>, vector<32x32xf32>
    %cst = arith.constant dense<0.000000e+00> : vector<16x32xf32>
    %2 = tpu.matmul %0, %1, %cst {dimension_numbers = #tpu.dot_dimension_numbers<[1], [0], [0], [1], [0, 0, 1, 1], [], []>} : vector<16x32xf32>, vector<32x32xf32>, vector<16x32xf32> -> vector<16x32xf32>
    %c0_3 = arith.constant 0 : index
    %c0_4 = arith.constant 0 : index
    %3 = vector.load %arg12[%c0_3, %c0_4] : memref<16x32xf32, #tpu.memory_space<vmem>>, vector<16x32xf32>
    tpu.vector_store %arg12[%c0_3, %c0_4], %2 {strides = array<i32>} : memref<16x32xf32, #tpu.memory_space<vmem>>, vector<16x32xf32>,
    %c0_i32 = arith.constant 0 : i32
    %4 = arith.cmpi eq, %arg0, %c0_i32 : i32
    %5 = arith.extui %4 : i1 to i32
    %c0_i32_5 = arith.constant 0 : i32
    %6 = arith.cmpi ne, %5, %c0_i32_5 : i32
    scf.if %6 {
      %c0_6 = arith.constant 0 : index
      %c0_7 = arith.constant 0 : index
      %7 = vector.load %arg5[%c0_6, %c0_7] : memref<2x16xf32, #tpu.memory_space<vmem>>, vector<2x16xf32>
      %c0_8 = arith.constant 0 : index
      %c0_9 = arith.constant 0 : index
      %8 = vector.load %arg9[%c0_8, %c0_9] : memref<16x64xf32, #tpu.memory_space<vmem>>, vector<16x64xf32>
      %cst_10 = arith.constant dense<0.000000e+00> : vector<2x64xf32>
      %9 = tpu.matmul %7, %8, %cst_10 {dimension_numbers = #tpu.dot_dimension_numbers<[1], [0], [0], [1], [0, 0, 1, 1], [], []>} : vector<2x16xf32>, vector<16x64xf32>, vector<2x64xf32> -> vector<2x64xf32>
      %c0_11 = arith.constant 0 : index
      %c0_12 = arith.constant 0 : index
      %10 = vector.load %arg6[%c0_11, %c0_12] : memref<2x16xf32, #tpu.memory_space<vmem>>, vector<2x16xf32>
      %c0_13 = arith.constant 0 : index
      %c0_14 = arith.constant 0 : index
      %11 = vector.load %arg10[%c0_13, %c0_14] : memref<16x64xf32, #tpu.memory_space<vmem>>, vector<16x64xf32>
      %cst_15 = arith.constant dense<0.000000e+00> : vector<2x64xf32>
      %12 = tpu.matmul %10, %11, %cst_15 {dimension_numbers = #tpu.dot_dimension_numbers<[1], [0], [0], [1], [0, 0, 1, 1], [], []>} : vector<2x16xf32>, vector<16x64xf32>, vector<2x64xf32> -> vector<2x64xf32>
      %13 = arith.addf %9, %12 : vector<2x64xf32>
      %c0_16 = arith.constant 0 : index
      %c0_17 = arith.constant 0 : index
      %14 = vector.load %arg3[%c0_16, %c0_17] : memref<2x32xf32, #tpu.memory_space<vmem>>, vector<2x32xf32>
      %c0_18 = arith.constant 0 : index
      %c0_19 = arith.constant 0 : index
      %15 = vector.load %arg7[%c0_18, %c0_19] : memref<32x64xf32, #tpu.memory_space<vmem>>, vector<32x64xf32>
      %cst_20 = arith.constant dense<0.000000e+00> : vector<2x64xf32>
      %16 = tpu.matmul %14, %15, %cst_20 {dimension_numbers = #tpu.dot_dimension_numbers<[1], [0], [0], [1], [0, 0, 1, 1], [], []>} : vector<2x32xf32>, vector<32x64xf32>, vector<2x64xf32> -> vector<2x64xf32>
      %17 = arith.addf %13, %16 : vector<2x64xf32>
      %c0_21 = arith.constant 0 : index
      %c0_22 = arith.constant 0 : index
      %18 = vector.load %arg4[%c0_21, %c0_22] : memref<2x32xf32, #tpu.memory_space<vmem>>, vector<2x32xf32>
      %c0_23 = arith.constant 0 : index
      %c0_24 = arith.constant 0 : index
      %19 = vector.load %arg8[%c0_23, %c0_24] : memref<32x64xf32, #tpu.memory_space<vmem>>, vector<32x64xf32>
      %cst_25 = arith.constant dense<0.000000e+00> : vector<2x64xf32>
      %20 = tpu.matmul %18, %19, %cst_25 {dimension_numbers = #tpu.dot_dimension_numbers<[1], [0], [0], [1], [0, 0, 1, 1], [], []>} : vector<2x32xf32>, vector<32x64xf32>, vector<2x64xf32> -> vector<2x64xf32>
      %21 = arith.addf %17, %20 : vector<2x64xf32>
      %c0_26 = arith.constant 0 : index
      %c0_27 = arith.constant 0 : index
      %22 = vector.load %arg11[%c0_26, %c0_27] : memref<1x64xf32, #tpu.memory_space<vmem>>, vector<1x64xf32>
      %23 = vector.broadcast %22 : vector<1x64xf32> to vector<2x64xf32>
      %24 = arith.addf %21, %23 : vector<2x64xf32>
      %c0_28 = arith.constant 0 : index
      %c0_29 = arith.constant 0 : index
      %25 = vector.load %arg13[%c0_28, %c0_29] : memref<2x64xf32, #tpu.memory_space<vmem>>, vector<2x64xf32>
      tpu.vector_store %arg13[%c0_28, %c0_29], %24 {strides = array<i32>} : memref<2x64xf32, #tpu.memory_space<vmem>>, vector<2x64xf32>,
    } else {
    }
    return
  }
  func.func @transform_0(%arg0: i32) -> (i32, i32) {
    %c0_i32 = arith.constant 0 : i32
    %c0_i32_0 = arith.constant 0 : i32
    return %arg0, %c0_i32 : i32, i32
  }
  func.func @transform_1(%arg0: i32) -> (i32, i32) {
    %c0_i32 = arith.constant 0 : i32
    %c0_i32_0 = arith.constant 0 : i32
    %c0_i32_1 = arith.constant 0 : i32
    return %c0_i32, %c0_i32_0 : i32, i32
  }
  func.func @transform_2(%arg0: i32) -> (i32, i32) {
    %c0_i32 = arith.constant 0 : i32
    %c0_i32_0 = arith.constant 0 : i32
    %c0_i32_1 = arith.constant 0 : i32
    return %c0_i32, %c0_i32_0 : i32, i32
  }
  func.func @transform_3(%arg0: i32) -> (i32, i32) {
    %c0_i32 = arith.constant 0 : i32
    %c0_i32_0 = arith.constant 0 : i32
    %c0_i32_1 = arith.constant 0 : i32
    return %c0_i32, %c0_i32_0 : i32, i32
  }
  func.func @transform_4(%arg0: i32) -> (i32, i32) {
    %c0_i32 = arith.constant 0 : i32
    %c0_i32_0 = arith.constant 0 : i32
    %c0_i32_1 = arith.constant 0 : i32
    return %c0_i32, %c0_i32_0 : i32, i32
  }
  func.func @transform_5(%arg0: i32) -> (i32, i32) {
    %c0_i32 = arith.constant 0 : i32
    %c0_i32_0 = arith.constant 0 : i32
    %c0_i32_1 = arith.constant 0 : i32
    return %c0_i32, %c0_i32_0 : i32, i32
  }
  func.func @transform_6(%arg0: i32) -> (i32, i32) {
    %c0_i32 = arith.constant 0 : i32
    %c0_i32_0 = arith.constant 0 : i32
    %c0_i32_1 = arith.constant 0 : i32
    return %c0_i32, %c0_i32_0 : i32, i32
  }
  func.func @transform_7(%arg0: i32) -> (i32, i32) {
    %c0_i32 = arith.constant 0 : i32
    %c0_i32_0 = arith.constant 0 : i32
    %c0_i32_1 = arith.constant 0 : i32
    return %c0_i32, %c0_i32_0 : i32, i32
  }
  func.func @transform_8(%arg0: i32) -> (i32, i32) {
    %c0_i32 = arith.constant 0 : i32
    %c0_i32_0 = arith.constant 0 : i32
    %c0_i32_1 = arith.constant 0 : i32
    return %c0_i32, %c0_i32_0 : i32, i32
  }
  func.func @transform_9(%arg0: i32) -> (i32, i32) {
    %c0_i32 = arith.constant 0 : i32
    %c0_i32_0 = arith.constant 0 : i32
    %c0_i32_1 = arith.constant 0 : i32
    return %c0_i32, %c0_i32_0 : i32, i32
  }
  func.func @transform_10(%arg0: i32) -> (i32, i32) {
    %c0_i32 = arith.constant 0 : i32
    %c0_i32_0 = arith.constant 0 : i32
    %c0_i32_1 = arith.constant 0 : i32
    return %c0_i32, %c0_i32_0 : i32, i32
  }
  func.func @transform_11(%arg0: i32) -> (i32, i32) {
    %c0_i32 = arith.constant 0 : i32
    %c0_i32_0 = arith.constant 0 : i32
    return %arg0, %c0_i32 : i32, i32
  }
  func.func @transform_12(%arg0: i32) -> (i32, i32) {
    %c0_i32 = arith.constant 0 : i32
    %c0_i32_0 = arith.constant 0 : i32
    %c0_i32_1 = arith.constant 0 : i32
    return %c0_i32, %c0_i32_0 : i32, i32
  }
}

</mosaic_0001>

<bundles_post_ra>
// kernel: moco_head_eval_forward.1
= control target key start
LH: loop header
LB: loop body
LE: loop exit
PB: predicated region body
PF: predicated region fallthrough
CT: control target
= control target key end

     0   :  { %18 = vsyncpa [#allocation3], 0  ;;  %s994_s0 = inlined_call_operand.vmem [shape: f32[16,32], index: 0, kind: input, shape index: {}]   ;;  %s995_s1 = inlined_call_operand.hbm [shape: f32[32,32], index: 1, kind: input, shape index: {}]   ;;  %s996_s2 = inlined_call_operand.hbm [shape: f32[2,32], index: 2, kind: input, shape index: {}]   ;;  %s997_s3 = inlined_call_operand.vmem [shape: f32[2,32], index: 3, kind: input, shape index: {}]   ;;  %s998_s4 = inlined_call_operand.vmem [shape: f32[2,16], index: 4, kind: input, shape index: {}]   ;;  %s999_s5 = inlined_call_operand.hbm [shape: f32[2,16], index: 5, kind: input, shape index: {}]   ;;  %s1000_s6 = inlined_call_operand.hbm [shape: f32[32,64], index: 6, kind: input, shape index: {}]   ;;  %s1001_s7 = inlined_call_operand.hbm [shape: f32[32,64], index: 7, kind: input, shape index: {}]   ;;  %s1002_s8 = inlined_call_operand.hbm [shape: f32[16,64], index: 8, kind: input, shape index: {}]   ;;  %s1003_s9 = inlined_call_operand.hbm [shape: f32[16,64], index: 9, kind: input, shape index: {}]   ;;  %s1004_s10 = inlined_call_operand.hbm [shape: f32[1,64], index: 10, kind: input, shape index: {}]   ;;  %s1005_s11 = inlined_call_operand.vmem [shape: f32[16,32], index: 11, kind: output, shape index: {0}]   ;;  %s1006_s12 = inlined_call_operand.vmem [shape: f32[2,64], index: 12, kind: output, shape index: {1}]  }
   0x1   :  { %19 = vsyncpa [#allocation5], 0 }
   0x2   :  { %20 = vsyncpa [#allocation8], 0 }
   0x3   :  { %21 = vsyncpa [#allocation11], 0 }
   0x4   :  { %22 = vsyncpa [#allocation14], 0  ;;  %s829_s21 = smov [#allocation4]  }
   0x5   :  { %s43_s22 = sshll.u32 %s829_s21, 4  ;;  %s44_s22 = int_to_ptr.vmem [resolvable:$true] %s43_s22 }
   0x6   :  { %s667_s23 = scalar_lea.vmem %s44_s22, 32  ;;  %p672_p1 = scmp.lt.s32.totalorder %s44_s22, %s44_s22 }
   0x7   :  { %p668_p0 = scmp.ne.s32.totalorder %s44_s22, %s667_s23  ;;  %p673_p2 = scmp.lt.s32.totalorder %s667_s23, %s667_s23 }
   0x9   :  { %p674_p3 = por %p673_p2, %p672_p1 }
   0xb   :  { %p675_p4 = pnand %p674_p3, %p668_p0 }
   0xd   :  { %678 = shalt.err (!%p675_p4)
}
   0xe   :  { %46 = dma.hbm_to_vmem [thread:$0]  %s996_s2, 32, %s44_s22, [#allocation5]  }
   0xf   :  { %s830_s26 = smov [#allocation7]   ;;  %s831_s28 = smov [#allocation10]  }
  0x10   :  { %s66_s27 = sshll.u32 %s830_s26, 4  ;;  %s90_s29 = sshll.u32 %s831_s28, 4  ;;  %s67_s27 = int_to_ptr.vmem [resolvable:$true] %s66_s27  ;;  %s91_s29 = int_to_ptr.vmem [resolvable:$true] %s90_s29 }
  0x11   :  { %s687_s30 = scalar_lea.vmem %s67_s27, 512  ;;  %p692_p6 = scmp.lt.s32.totalorder %s67_s27, %s67_s27 }
  0x12   :  { %p688_p5 = scmp.ne.s32.totalorder %s67_s27, %s687_s30  ;;  %p693_p7 = scmp.lt.s32.totalorder %s687_s30, %s687_s30 }
  0x14   :  { %p694_p8 = por %p693_p7, %p692_p6 }
  0x16   :  { %p695_p9 = pnand %p694_p8, %p688_p5 }
  0x18   :  { %698 = shalt.err (!%p695_p9)
}
  0x19   :  { %s832_s13 = smov 128   ;;  %s833_s14 = smov 8  }
  0x1a   :  { %72 = dma.hbm_to_vmem [thread:$0]  %s1000_s6, 512, %s67_s27, [#allocation8], %s832_s13, %s832_s13, %s833_s14  }
  0x1b   :  { %s707_s2 = scalar_lea.vmem %s91_s29, 256  ;;  %p712_p11 = scmp.lt.s32.totalorder %s91_s29, %s91_s29 }
  0x1c   :  { %p708_p10 = scmp.ne.s32.totalorder %s91_s29, %s707_s2  ;;  %p713_p12 = scmp.lt.s32.totalorder %s707_s2, %s707_s2 }
  0x1e   :  { %p714_p13 = por %p713_p12, %p712_p11 }
  0x20   :  { %p715_p0 = pnand %p714_p13, %p708_p10 }
  0x22   :  { %718 = shalt.err (!%p715_p0)
}
  0x23   :  { %96 = dma.hbm_to_vmem [thread:$0]  %s1002_s8, 256, %s91_s29, [#allocation11], %s832_s13, %s832_s13, %s833_s14  }
  0x24   :  { %s834_s19 = smov [#allocation2]   ;;  %s835_s21 = smov [#allocation6]  }
  0x25   :  { %s30_s20 = sshll.u32 %s834_s19, 4  ;;  %s57_s6 = sshll.u32 %s835_s21, 4  ;;  %s31_s20 = int_to_ptr.vmem [resolvable:$true] %s30_s20  ;;  %s58_s6 = int_to_ptr.vmem [resolvable:$true] %s57_s6 }
  0x26   :  { %s727_s22 = scalar_lea.vmem %s31_s20, 512  ;;  %p732_p2 = scmp.lt.s32.totalorder %s31_s20, %s31_s20 }
  0x27   :  { %p728_p1 = scmp.ne.s32.totalorder %s31_s20, %s727_s22  ;;  %p733_p3 = scmp.lt.s32.totalorder %s727_s22, %s727_s22 }
  0x29   :  { %p734_p4 = por %p733_p3, %p732_p2 }
  0x2b   :  { %p735_p5 = pnand %p734_p4, %p728_p1 }
  0x2d   :  { %738 = shalt.err (!%p735_p5)
}
  0x2e   :  { %36 = dma.hbm_to_vmem [thread:$0]  %s995_s1, 512, %s31_s20, [#allocation3], %s832_s13, %s832_s13, %s833_s14  }
  0x2f   :  { %s747_s8 = scalar_lea.vmem %s58_s6, 32  ;;  %p752_p7 = scmp.lt.s32.totalorder %s58_s6, %s58_s6 }
  0x30   :  { %p748_p6 = scmp.ne.s32.totalorder %s58_s6, %s747_s8  ;;  %p753_p8 = scmp.lt.s32.totalorder %s747_s8, %s747_s8 }
  0x32   :  { %p754_p9 = por %p753_p8, %p752_p7 }
  0x34   :  { %p755_p10 = pnand %p754_p9, %p748_p6 }
  0x36   :  { %758 = shalt.err (!%p755_p10)
}
  0x37   :  { %60 = dma.hbm_to_vmem [thread:$0]  %s999_s5, 32, %s58_s6, [#allocation5]  }
  0x38   :  { %s836_s27 = smov [#allocation9]   ;;  %s837_s29 = smov [#allocation12]  }
  0x39   :  { %s78_s28 = sshll.u32 %s836_s27, 4  ;;  %s102_s30 = sshll.u32 %s837_s29, 4  ;;  %s79_s28 = int_to_ptr.vmem [resolvable:$true] %s78_s28  ;;  %s103_s30 = int_to_ptr.vmem [resolvable:$true] %s102_s30 }
  0x3a   :  { %s767_s15 = scalar_lea.vmem %s79_s28, 512  ;;  %p772_p12 = scmp.lt.s32.totalorder %s79_s28, %s79_s28 }
  0x3b   :  { %p768_p11 = scmp.ne.s32.totalorder %s79_s28, %s767_s15  ;;  %p773_p13 = scmp.lt.s32.totalorder %s767_s15, %s767_s15 }
  0x3d   :  { %p774_p0 = por %p773_p13, %p772_p12 }
  0x3f   :  { %p775_p1 = pnand %p774_p0, %p768_p11 }
  0x41   :  { %778 = shalt.err (!%p775_p1)
}
  0x42   :  { %84 = dma.hbm_to_vmem [thread:$0]  %s1001_s7, 512, %s79_s28, [#allocation8], %s832_s13, %s832_s13, %s833_s14  }
  0x43   :  { %s787_s5 = scalar_lea.vmem %s103_s30, 256  ;;  %p792_p3 = scmp.lt.s32.totalorder %s103_s30, %s103_s30 }
  0x44   :  { %p788_p2 = scmp.ne.s32.totalorder %s103_s30, %s787_s5  ;;  %p793_p4 = scmp.lt.s32.totalorder %s787_s5, %s787_s5 }
  0x46   :  { %p794_p5 = por %p793_p4, %p792_p3 }
  0x48   :  { %p795_p6 = pnand %p794_p5, %p788_p2 }
  0x4a   :  { %798 = shalt.err (!%p795_p6)
}
  0x4b   :  { %108 = dma.hbm_to_vmem [thread:$0]  %s1003_s9, 256, %s103_s30, [#allocation11], %s832_s13, %s832_s13, %s833_s14  }
  0x4c   :  { %s838_s18 = smov [#allocation13]  }
  0x4d   :  { %s115_s19 = sshll.u32 %s838_s18, 4  ;;  %s116_s19 = int_to_ptr.vmem [resolvable:$true] %s115_s19 }
  0x4e   :  { %s807_s20 = scalar_lea.vmem %s116_s19, 16  ;;  %s811_s7 = scalar_lea.vmem %s116_s19, 32 }
  0x4f   :  { %p808_p7 = scmp.ne.s32.totalorder %s116_s19, %s807_s20  ;;  %p812_p8 = scmp.lt.s32.totalorder %s116_s19, %s116_s19 }
  0x50   :  { %p813_p9 = scmp.lt.s32.totalorder %s811_s7, %s807_s20 }
  0x52   :  { %p814_p10 = por %p813_p9, %p812_p8 }
  0x54   :  { %p815_p11 = pnand %p814_p10, %p808_p7 }
  0x56   :  { %818 = shalt.err (!%p815_p11)
}
  0x57   :  { %118 = dma.hbm_to_vmem [thread:$0]  %s1004_s10, 16, %s116_s19, [#allocation14]  }
  0x58   :  { %819 = dma.done.wait [#allocation3], 512  }
  0x59   :  { %820 = vsyncadd [#allocation3], 4294966784 }
  0x5a   :  { %821 = dma.done.wait [#allocation5], 64  }
  0x5b   :  { %822 = vsyncadd [#allocation5], 4294967232 }
  0x5c   :  { %823 = dma.done.wait [#allocation8], 1024  }
  0x5d   :  { %824 = vsyncadd [#allocation8], 4294966272 }
  0x5e   :  { %825 = dma.done.wait [#allocation11], 512  }
  0x5f   :  { %826 = vsyncadd [#allocation11], 4294966784 }
  0x60   :  { %827 = dma.done.wait [#allocation14], 16  }
  0x61   :  { %828 = vsyncadd [#allocation14], 4294967280  ;;  %v839_v0 = vmov 0.0   ;;  %vm840_vm0 = vmmov 0   ;;  %v148_v1 = vld [vmem:[#allocation2 + $0x18] sm:$0xff]  ;;  %v147_v3 = vld [vmem:[#allocation2 + $0x10] sm:$0xff] }
  0x62   :  { %611 = vmatprep.subr.mxu1 %v839_v0  ;;  %615 = vmatprep.mubr.msk.f32.mxu1 %vm840_vm0, %v839_v0  ;;  %v242_v2 = vld [vmem:[#allocation12 + $0x8] sm:$0xff]  ;;  %v241_v4 = vld [vmem:[#allocation12] sm:$0xff]  ;;  %vm243_vm1 = vcmask 130048   ;;  %v146_v6 = vld [vmem:[#allocation2 + $0x8] sm:$0xff]  ;;  %vm149_vm2 = vcmask 261120   ;;  %vm556_vm3 = vcmask 517120  }
  0x63   :  { %600 = vmatprep.subr.mxu0 %v148_v1  ;;  %612 = vmatpush3.msra.mxu1 %v242_v2  ;;  %v240_v5 = vld [vmem:[#allocation6] sm:$0x3]  ;;  %v239_v7 = vld [vmem:[#allocation10 + $0x8] sm:$0xff]  ;;  %v238_v9 = vld [vmem:[#allocation10] sm:$0xff] }
  0x64   :  { %601 = vmatpush3.msra.mxu0 %v148_v1  ;;  %613 = vmatprep.subr.mxu1 %v839_v0  ;;  %v145_v8 = vld [vmem:[#allocation2] sm:$0xff]  ;;  %v144_v12 = vld [vmem:[%s994_s0 + $0x8] sm:$0xff]  ;;  %v393_v15 = vld [vmem:[#allocation7 + $0x10] sm:$0xff] }
  0x65   :  { %602 = vmatprep.subr.mxu0 %v147_v3  ;;  %614 = vmatpush3.msra.mxu1 %v241_v4  ;;  %v143_v10 = vld [vmem:[%s994_s0] sm:$0xff]  ;;  %v472_v16 = vld [vmem:[#allocation9 + $0x10] sm:$0xff]  ;;  %v392_v17 = vld [vmem:[#allocation7 + $0x8] sm:$0xff] }
  0x66   :  { %603 = vmatpush3.msra.mxu0 %v147_v3  ;;  %616 = vmatmul.mubr.msk.f32.vlgmr.msra.gmra.mxu1 %vm243_vm1, %v240_v5  ;;  %v237_v11 = vld [vmem:[%s998_s4] sm:$0x3]  ;;  %v471_v18 = vld [vmem:[#allocation9 + $0x8] sm:$0xff]  ;;  %v391_v19 = vld [vmem:[#allocation7] sm:$0xff] }
  0x67   :  { %618 = vmatprep.subr.mxu1 %v839_v0  ;;  %604 = vmatprep.subr.mxu0 %v146_v6  ;;  %v394_v13 = vld [vmem:[#allocation7 + $0x18] sm:$0xff]  ;;  %v470_v20 = vld [vmem:[#allocation9] sm:$0xff] }
  0x68   :  { %619 = vmatpush3.msra.mxu1 %v239_v7  ;;  %605 = vmatpush3.msra.mxu0 %v146_v6  ;;  %v473_v14 = vld [vmem:[#allocation9 + $0x18] sm:$0xff]  ;;  %v577_v33 = vld [vmem:[#allocation13] ss:$0 sm:$0xff] }
  0x69   :  { %620 = vmatprep.subr.mxu1 %v839_v0  ;;  %606 = vmatprep.subr.mxu0 %v145_v8  ;;  %v390_v21 = vld [vmem:[#allocation4] sm:$0x3] }
  0x6a   :  { %621 = vmatpush3.msra.mxu1 %v238_v9  ;;  %622 = vmatprep.mubr.msk.f32.mxu1 %vm840_vm0, %v839_v0  ;;  %v469_v22 = vld [vmem:[%s997_s3] sm:$0x3] }
  0x6b   :  { %607 = vmatpush3.msra.mxu0 %v145_v8  ;;  %608 = vmatprep.mubr.msk.f32.mxu0 %vm149_vm2, %v143_v10 }
  0x6c   :  { %623 = vmatmul.mubr.msk.f32.vlgmr.msra.gmra.mxu1 %vm243_vm1, %v237_v11  ;;  %609 = vmatmul.mubr.msk.f32.vlgmr.msra.gmra.mxu0 %vm149_vm2, %v144_v12 }
  0x6d   :  { %625 = vmatprep.subr.mxu0 %v839_v0  ;;  %636 = vmatprep.subr.mxu1 %v839_v0 }
  0x6e   :  { %626 = vmatpush3.msra.mxu0 %v394_v13  ;;  %637 = vmatpush3.msra.mxu1 %v473_v14 }
  0x6f   :  { %627 = vmatprep.subr.mxu0 %v839_v0  ;;  %638 = vmatprep.subr.mxu1 %v839_v0 }
  0x70   :  { %628 = vmatpush3.msra.mxu0 %v393_v15  ;;  %639 = vmatpush3.msra.mxu1 %v472_v16 }
  0x71   :  { %629 = vmatprep.subr.mxu0 %v839_v0  ;;  %640 = vmatprep.subr.mxu1 %v839_v0 }
  0x72   :  { %630 = vmatpush3.msra.mxu0 %v392_v17  ;;  %641 = vmatpush3.msra.mxu1 %v471_v18 }
  0x73   :  { %631 = vmatprep.subr.mxu0 %v839_v0  ;;  %642 = vmatprep.subr.mxu1 %v839_v0 }
  0x74   :  { %632 = vmatpush3.msra.mxu0 %v391_v19  ;;  %633 = vmatprep.mubr.msk.f32.mxu0 %vm840_vm0, %v839_v0 }
  0x75   :  { %643 = vmatpush3.msra.mxu1 %v470_v20  ;;  %644 = vmatprep.mubr.msk.f32.mxu1 %vm840_vm0, %v839_v0 }
  0x76   :  { %634 = vmatmul.mubr.msk.f32.vlgmr.msra.gmra.mxu0 %vm149_vm2, %v390_v21  ;;  %645 = vmatmul.mubr.msk.f32.vlgmr.msra.gmra.mxu1 %vm149_vm2, %v469_v22 }
 0x126   :  { %v313_v23 = vpop.f32.mrf.mxu1 }
 0x128   :  { %v617_v24 = vpop.f32.mrf.mxu1 }
 0x12c   :  { %v386_v25 = vpop.f32.mrf.mxu1  ;;  %v610_v26 = vpop.f32.mrf.mxu0 }
 0x12d   :  { %232 = vst.msk [vmem:[%s1005_s11 + $0x8] sm:$0xff] %vm149_vm2, %v610_v26  ;;  %v387_v29 = vadd.f32 %v386_v25, %v313_v23 }
 0x12e   :  { %v222_v27 = vpop.f32.mrf.mxu0  ;;  %v624_v28 = vpop.f32.mrf.mxu1 }
 0x12f   :  { %231 = vst.msk [vmem:[%s1005_s11] sm:$0xff] %vm149_vm2, %v222_v27 }
 0x136   :  { %v464_v30 = vpop.f32.mrf.mxu0  ;;  %v543_v31 = vpop.f32.mrf.mxu1 }
 0x137   :  { %v468_v32 = vadd.f32 %v464_v30, %v387_v29 }
 0x138   :  { %v635_v34 = vpop.f32.mrf.mxu0  ;;  %v646_v35 = vpop.f32.mrf.mxu1 }
 0x139   :  { %v547_v36 = vadd.f32 %v543_v31, %v468_v32 }
 0x13b   :  { %v555_v37 = vadd.f32 %v577_v33, %v547_v36 }
 0x13d   :  { %557 = vst.msk [vmem:[%s1006_s12] sm:$0x3] %vm556_vm3, %v555_v37 }
 0x13e   :  { %566 = vsyncpa [#allocation3], 1 }
 0x13f   :  { %567 = vsyncpa [#allocation5], 1 }
 0x140   :  { %568 = vsyncpa [#allocation8], 1 }
 0x141   :  { %569 = vsyncpa [#allocation11], 1 }
 0x142   :  { %570 = vsyncpa [#allocation14], 1 }

</bundles_post_ra>
